<compile_context>
chip_gen: v7x
topology: tpu7x:2x2x1
jax: 0.10.0
libtpu: 0.0.40
codegen_flags: <defaults>
</compile_context>

<pallas_src>
import functools

import jax
import jax.numpy as jnp
from jax.experimental import pallas as pl
from jax.experimental.pallas import tpu as pltpu

_LANE = 128            # lane width: pad class dim to a multiple of this
_SUBLANE_BF16 = 16     # bf16 sublane packing: batch tiles must be multiples of 16
_NEG_BIG = -1e30       # f32 bias for padded (fake) classes -> exp underflows to 0


def _round_up(x, m):
    return ((x + m - 1) // m) * m


# ---------------------------------------------------------------------------
# Kernel: fused classifier head  softmax(x @ W_eff + b_eff)
# ---------------------------------------------------------------------------
def _fused_head_kernel(x_ref, w_ref, b_ref, out_ref):
    # x: [bt, D] bf16 ; w: [D, CP] bf16 ; b: [1, CP] f32 ; out: [bt, CP] bf16
    logits = jnp.dot(x_ref[...], w_ref[...],
                     preferred_element_type=jnp.float32) + b_ref[...]
    # numerically stable softmax over the lane-dense padded class axis (f32)
    m = jnp.max(logits, axis=-1, keepdims=True)
    e = jnp.exp(logits - m)                     # padded lanes -> exp(-1e30) == 0
    denom = jnp.sum(e, axis=-1, keepdims=True)
    # NOTE: pl.reciprocal(denom, approx=True) would move the divide to the EUP,
    # but this kernel is DMA-bound, so keep the exact divide.
    out_ref[...] = (e / denom).astype(out_ref.dtype)


# ---------------------------------------------------------------------------
# Parameter fusion (in-graph, training-safe)
# ---------------------------------------------------------------------------
def fuse_head_params(params):
    """Fuse pre_classifier + classifier (valid: no activation/dropout between
    them in this forward) and pad the class axis to 128 lanes. Called inside
    the jitted forward every step so gradients flow through the raw params."""
    w1_t = params["w1_t"].astype(jnp.float32)   # [D, D]  (in, out) layout
    b1 = params["b1"].astype(jnp.float32)       # [D]
    w2_t = params["w2_t"].astype(jnp.float32)   # [D, C]
    b2 = params["b2"].astype(jnp.float32)       # [C]

    D, C = w2_t.shape
    w_eff = w1_t @ w2_t                          # [D, C]
    b_eff = b1 @ w2_t + b2                       # [C]

    cp = _round_up(max(C, _LANE), _LANE)
    w_pad = jnp.zeros((D, cp), jnp.float32).at[:, :C].set(w_eff)
    w_pad = w_pad.astype(jnp.bfloat16)           # bf16 MXU operand
    # keep the padded bias f32: -1e30 in bf16 would be -inf and can NaN
    b_pad = jnp.full((1, cp), _NEG_BIG, jnp.float32).at[0, :C].set(b_eff)
    return w_pad, b_pad, C


# ---------------------------------------------------------------------------
# Wrapper
# ---------------------------------------------------------------------------
def _choose_tile(batch, batch_tile):
    """Pick a bf16-legal batch tile and padded row count.

    - tile is a multiple of 16 (bf16 sublane packing)
    - batch is padded up so the grid divides evenly (no tail assert)
    - for large batches, guarantee >= 2 grid steps so "parallel" can shard
      across both TensorCores on v7x (v5e/v6e single-TC: harmless).
    """
    b16 = _round_up(batch, _SUBLANE_BF16)
    bt = _round_up(min(batch_tile, b16), _SUBLANE_BF16)
    if b16 >= 4 * _SUBLANE_BF16 and b16 // bt < 2:
        bt = _round_up(pl.cdiv(b16, 2), _SUBLANE_BF16)
    b_rows = _round_up(b16, bt)
    return bt, b_rows


def moral_ground_head(hidden, w_eff_pad, b_eff_pad, n_classes, *, batch_tile=1024):
    """hidden: [B, D] float ; w_eff_pad: [D, CP] bf16 ; b_eff_pad: [1, CP] f32
    -> pred [B, n_classes] bf16."""
    B, D = hidden.shape
    CP = w_eff_pad.shape[1]

    x = hidden.astype(jnp.bfloat16)              # halve the dominant HBM stream
    bt, b_rows = _choose_tile(B, batch_tile)
    if b_rows != B:
        x = jnp.pad(x, ((0, b_rows - B), (0, 0)))
    grid = (b_rows // bt,)

    bytes_accessed = (b_rows * D * 2            # x (bf16)
                      + D * CP * 2              # W_eff (bf16, resident)
                      + CP * 4                  # b_eff (f32)
                      + b_rows * CP * 2)        # out (bf16)

    pred_pad = pl.pallas_call(
        _fused_head_kernel,
        out_shape=jax.ShapeDtypeStruct((b_rows, CP), jnp.bfloat16),
        grid=grid,
        in_specs=[
            pl.BlockSpec((bt, D), lambda i: (i, 0)),    # x tile over batch
            pl.BlockSpec((D, CP), lambda i: (0, 0)),    # fused weight (resident)
            pl.BlockSpec((1, CP), lambda i: (0, 0)),    # fused bias  (resident)
        ],
        out_specs=pl.BlockSpec((bt, CP), lambda i: (i, 0)),
        compiler_params=pltpu.CompilerParams(
            dimension_semantics=("parallel",)),
        cost_estimate=pl.CostEstimate(
            flops=2 * b_rows * D * CP,
            transcendentals=b_rows * CP,
            bytes_accessed=bytes_accessed),
    )(x, w_eff_pad, b_eff_pad)

    # drop padded rows / zero-probability padded lanes; fuses under jit
    return pred_pad[:B, :n_classes]


@jax.jit
def moral_ground_forward(hidden_situ, params, labels):
    """Mirrors MoralGroundTrainerBaseline.forward: returns (pred, label).
    Dropout is defined on the module but never applied in forward, so omitted."""
    w_pad, b_pad, n_classes = fuse_head_params(params)
    pred = moral_ground_head(hidden_situ, w_pad, b_pad, n_classes)
    return pred, labels


def init_params(key, d_model, n_classes):
    """torch.nn.Linear-shaped params (stored transposed as [in, out])."""
    k1, k2, k3, k4 = jax.random.split(key, 4)
    bound = 1.0 / (d_model ** 0.5)
    w1 = jax.random.uniform(k1, (d_model, d_model), jnp.float32, -bound, bound)
    b1 = jax.random.uniform(k2, (d_model,), jnp.float32, -bound, bound)
    w2 = jax.random.uniform(k3, (n_classes, d_model), jnp.float32, -bound, bound)
    b2 = jax.random.uniform(k4, (n_classes,), jnp.float32, -bound, bound)
    return {"w1_t": w1.T, "b1": b1, "w2_t": w2.T, "b2": b2}


if __name__ == "__main__":
    d_model = 128     # hidden size of the (synthetic) encoder output
    n_classes = 2
    batch = 8

    key = jax.random.PRNGKey(0)
    k_hidden, k_params, k_label = jax.random.split(key, 3)

    # Stand-in for encoder's last_hidden_state[:, 0, :]
    hidden_situ = jax.random.normal(k_hidden, (batch, d_model), dtype=jnp.float32)
    labels = jax.random.randint(k_label, (batch,), 0, n_classes)
    params = init_params(k_params, d_model, n_classes)

    pred, out_labels = moral_ground_forward(hidden_situ, params, labels)
    pred = jax.block_until_ready(pred)
    assert pred.shape == (batch, n_classes)
    assert pred.dtype == jnp.bfloat16
    pred_f32 = pred.astype(jnp.float32)

    # --- Reference 1: identical fused bf16 path in pure JAX ---
    w_pad, b_pad, _ = fuse_head_params(params)
    x_bf = hidden_situ.astype(jnp.bfloat16)
    ref_logits_pad = jnp.dot(x_bf, w_pad, preferred_element_type=jnp.float32) + b_pad
    ref_fused = jax.nn.softmax(ref_logits_pad, axis=-1).astype(jnp.bfloat16)
    ref_fused = ref_fused[:, :n_classes].astype(jnp.float32)
    assert jnp.allclose(pred_f32, ref_fused, atol=1e-2, rtol=1e-2)

    # --- Reference 2: original two-Linear f32 semantics (loose: bf16 path) ---
    ref_pre = hidden_situ @ params["w1_t"] + params["b1"]
    ref_logits = ref_pre @ params["w2_t"] + params["b2"]
    ref_pred = jax.nn.softmax(ref_logits, axis=-1)
    assert jnp.allclose(pred_f32, ref_pred, atol=2e-2, rtol=2e-2)

    # Probabilities over real classes sum to 1 (padded lanes contribute 0;
    # tolerance covers bf16 output quantization).
    assert jnp.allclose(jnp.sum(pred_f32, axis=-1), 1.0, atol=1e-2)

    print("KERNEL_OK")
</pallas_src>

<mosaic_0001>
module attributes {stable_mosaic.version = 11 : i64} {
  func.func @_fused_head_kernel(%arg0: i32, %arg1: memref<16x128xbf16, #tpu.memory_space<vmem>>, %arg2: memref<128x128xbf16, #tpu.memory_space<vmem>>, %arg3: memref<1x128xf32, #tpu.memory_space<vmem>>, %arg4: memref<16x128xbf16, #tpu.memory_space<vmem>>) attributes {dimension_semantics = [#tpu.dimension_semantics<parallel>], iteration_bounds = array<i64: 1>, scalar_prefetch = 0 : i64, scratch_operands = 0 : i64, tpu.core_type = #tpu.core_type<tc>, window_params = [{transform_indices = @transform_0, window_bounds = array<i64: 16, 128>}, {pipeline_mode = #tpu.pipeline_mode<synchronous>, transform_indices = @transform_1, window_bounds = array<i64: 128, 128>}, {pipeline_mode = #tpu.pipeline_mode<synchronous>, transform_indices = @transform_2, window_bounds = array<i64: 1, 128>}, {transform_indices = @transform_3, window_bounds = array<i64: 16, 128>}]} {
    %c0 = arith.constant 0 : index
    %c0_0 = arith.constant 0 : index
    %0 = vector.load %arg1[%c0, %c0_0] : memref<16x128xbf16, #tpu.memory_space<vmem>>, vector<16x128xbf16>
    %c0_1 = arith.constant 0 : index
    %c0_2 = arith.constant 0 : index
    %1 = vector.load %arg2[%c0_1, %c0_2] : memref<128x128xbf16, #tpu.memory_space<vmem>>, vector<128x128xbf16>
    %cst = arith.constant dense<0.000000e+00> : vector<16x128xf32>
    %2 = tpu.matmul %0, %1, %cst {dimension_numbers = #tpu.dot_dimension_numbers<[1], [0], [0], [1], [0, 0, 1, 1], [], []>} : vector<16x128xbf16>, vector<128x128xbf16>, vector<16x128xf32> -> vector<16x128xf32>
    %c0_3 = arith.constant 0 : index
    %c0_4 = arith.constant 0 : index
    %3 = vector.load %arg3[%c0_3, %c0_4] : memref<1x128xf32, #tpu.memory_space<vmem>>, vector<1x128xf32>
    %4 = vector.broadcast %3 : vector<1x128xf32> to vector<16x128xf32>
    %5 = arith.addf %2, %4 : vector<16x128xf32>
    %cst_5 = arith.constant dense<0xFF800000> : vector<16xf32>
    %6 = vector.multi_reduction <maximumf>, %5, %cst_5 [1] : vector<16x128xf32> to vector<16xf32>
    %7 = vector.shape_cast %6 : vector<16xf32> to vector<16x1xf32>
    %8 = vector.broadcast %7 : vector<16x1xf32> to vector<16x128xf32>
    %9 = arith.subf %5, %8 : vector<16x128xf32>
    %10 = math.exp %9 : vector<16x128xf32>
    %cst_6 = arith.constant dense<0.000000e+00> : vector<16xf32>
    %11 = vector.multi_reduction <add>, %10, %cst_6 [1] : vector<16x128xf32> to vector<16xf32>
    %12 = vector.shape_cast %11 : vector<16xf32> to vector<16x1xf32>
    %13 = vector.broadcast %12 : vector<16x1xf32> to vector<16x128xf32>
    %14 = arith.divf %10, %13 : vector<16x128xf32>
    %15 = arith.truncf %14 : vector<16x128xf32> to vector<16x128xbf16>
    %c0_7 = arith.constant 0 : index
    %c0_8 = arith.constant 0 : index
    %16 = vector.load %arg4[%c0_7, %c0_8] : memref<16x128xbf16, #tpu.memory_space<vmem>>, vector<16x128xbf16>
    tpu.vector_store %arg4[%c0_7, %c0_8], %15 {strides = array<i32>} : memref<16x128xbf16, #tpu.memory_space<vmem>>, vector<16x128xbf16>,
    return
  }
  func.func @transform_0(%arg0: i32) -> (i32, i32) {
    %c0_i32 = arith.constant 0 : i32
    %c0_i32_0 = arith.constant 0 : i32
    return %arg0, %c0_i32 : i32, i32
  }
  func.func @transform_1(%arg0: i32) -> (i32, i32) {
    %c0_i32 = arith.constant 0 : i32
    %c0_i32_0 = arith.constant 0 : i32
    %c0_i32_1 = arith.constant 0 : i32
    return %c0_i32, %c0_i32_0 : i32, i32
  }
  func.func @transform_2(%arg0: i32) -> (i32, i32) {
    %c0_i32 = arith.constant 0 : i32
    %c0_i32_0 = arith.constant 0 : i32
    %c0_i32_1 = arith.constant 0 : i32
    return %c0_i32, %c0_i32_0 : i32, i32
  }
  func.func @transform_3(%arg0: i32) -> (i32, i32) {
    %c0_i32 = arith.constant 0 : i32
    %c0_i32_0 = arith.constant 0 : i32
    return %arg0, %c0_i32 : i32, i32
  }
}

</mosaic_0001>

<bundles_post_ra>
// kernel: moral_ground_forward.1
= control target key start
LH: loop header
LB: loop body
LE: loop exit
PB: predicated region body
PF: predicated region fallthrough
CT: control target
= control target key end

     0   :  { %v234_v0 = vmov 0.0   ;;  %vm235_vm0 = vmmov 0   ;;  %s289_s1 = inlined_call_operand.vmem [shape: bf16[128,128], index: 1, kind: input, shape index: {}]   ;;  %s290_s0 = inlined_call_operand.vmem [shape: bf16[16,128], index: 0, kind: input, shape index: {}]   ;;  %s291_s2 = inlined_call_operand.vmem [shape: f32[1,128], index: 2, kind: input, shape index: {}]   ;;  %s292_s3 = inlined_call_operand.vmem [shape: bf16[16,128], index: 3, kind: output, shape index: {}]  }
   0x1   :  { %195 = vmatprep.subr.bf16.mxu0 %v234_v0  ;;  %v217_v1 = vld [vmem:[%s289_s1] sm:$0xff]   ;;  %211 = vmatprep.mubr.msk.bf16.mxu0 %vm235_vm0, %v234_v0  ;;  %v218_v2 = vld [vmem:[%s289_s1 + $0x8] sm:$0xff]   ;;  %v219_v3 = vld [vmem:[%s289_s1 + $0x10] sm:$0xff]  }
   0x2   :  { %196 = vmatpush3.bf16.msra.mxu0 %v217_v1  ;;  %v220_v4 = vld [vmem:[%s289_s1 + $0x18] sm:$0xff]   ;;  %v221_v5 = vld [vmem:[%s289_s1 + $0x20] sm:$0xff]   ;;  %v222_v6 = vld [vmem:[%s289_s1 + $0x28] sm:$0xff]  }
   0x3   :  { %197 = vmatprep.subr.bf16.mxu0 %v234_v0  ;;  %v223_v7 = vld [vmem:[%s289_s1 + $0x30] sm:$0xff]   ;;  %v224_v8 = vld [vmem:[%s289_s1 + $0x38] sm:$0xff]   ;;  %v225_v9 = vld [vmem:[%s290_s0] sm:$0xff]  }
   0x4   :  { %v167_v10 = vld [vmem:[%s291_s2] ss:$0 sm:$0xff] }
   0x6   :  { %198 = vmatpush3.bf16.msra.mxu0 %v218_v2 }
   0x7   :  { %199 = vmatprep.subr.bf16.mxu0 %v234_v0 }
   0xa   :  { %200 = vmatpush3.bf16.msra.mxu0 %v219_v3 }
   0xb   :  { %201 = vmatprep.subr.bf16.mxu0 %v234_v0 }
   0xe   :  { %202 = vmatpush3.bf16.msra.mxu0 %v220_v4 }
   0xf   :  { %203 = vmatprep.subr.bf16.mxu0 %v234_v0 }
  0x12   :  { %204 = vmatpush3.bf16.msra.mxu0 %v221_v5 }
  0x13   :  { %205 = vmatprep.subr.bf16.mxu0 %v234_v0 }
  0x16   :  { %206 = vmatpush3.bf16.msra.mxu0 %v222_v6 }
  0x17   :  { %207 = vmatprep.subr.bf16.mxu0 %v234_v0 }
  0x1a   :  { %208 = vmatpush3.bf16.msra.mxu0 %v223_v7 }
  0x1b   :  { %209 = vmatprep.subr.bf16.mxu0 %v234_v0 }
  0x1e   :  { %210 = vmatpush3.bf16.msra.mxu0 %v224_v8 }
  0x21   :  { %212 = vmatmul.mubr.bf16.vlgmr.msra.gmra.mrb[0].mxu0 %v225_v9 }
  0xf4   :  { %v128_v11 = vpop.f32.mrb[0].mxu0 }
  0xf5   :  { %v129_v12 = vadd.f32 %v167_v10, %v128_v11  ;;  %v213_v13 = vpop.f32.mrb[1].mxu0 }
  0xf6   :  { %v131_v14 = vpop.f32.mrb[2].mxu0 }
  0xf7   :  { %135 = vmax.xlane.f32.xlu0 %v129_v12  ;;  %v214_v15 = vpop.f32.mrb[3].mxu0  ;;  %v132_v16 = vadd.f32 %v167_v10, %v131_v14 }
  0xfb   :  { %137 = vmax.xlane.f32.xlu0 %v132_v16 }
 0x184   :  { %v136_v17 = vpop.xlane.xlu0 %135 }
 0x185   :  { %v139_v18 = vsub.f32 %v129_v12, %v136_v17 }
 0x187   :  { %v141_v19 = vmul.f32 1.442695, %v139_v18 }
 0x188   :  { %v138_v20 = vpop.xlane.xlu0 %137 }
 0x189   :  { %226 = vpow2.f32 %v141_v19  ;;  %v140_v21 = vsub.f32 %v132_v16, %v138_v20 }
 0x18b   :  { %v143_v22 = vmul.f32 1.442695, %v140_v21 }
 0x18d   :  { %228 = vpow2.f32 %v143_v22 }
 0x193   :  { %v227_v23 = vpop.eup %226 }
 0x194   :  { %145 = vadd.xlane.f32.xlu1 %v227_v23 }
 0x197   :  { %v229_v24 = vpop.eup %228 }
 0x198   :  { %147 = vadd.xlane.f32.xlu1 %v229_v24 }
 0x221   :  { %v146_v25 = vpop.xlane.xlu1 %145 }
 0x222   :  { %230 = vrcp.f32 %v146_v25 }
 0x225   :  { %v148_v26 = vpop.xlane.xlu1 %147 }
 0x226   :  { %232 = vrcp.f32 %v148_v26 }
 0x22c   :  { %v231_v27 = vpop.eup %230 }
 0x22d   :  { %v150_v29 = vmul.f32 %v231_v27, %v227_v23 }
 0x230   :  { %v233_v28 = vpop.eup %232 }
 0x231   :  { %v152_v30 = vmul.f32 %v233_v28, %v229_v24 }
 0x233   :  { %v184_v31 = vpack.c.bf16 %v152_v30, %v150_v29 }
 0x235   :  { %185 = vst [vmem:[%s292_s3] sm:$0xff] %v184_v31  }

</bundles_post_ra>
